<compile_context>
chip_gen: v6e
topology: v6e:2x2x1
jax: 0.10.0
libtpu: 0.0.40
codegen_flags: <defaults>
</compile_context>

<pallas_src>
import jax
import jax.numpy as jnp
from jax.experimental import pallas as pl
from jax.experimental.pallas import tpu as pltpu

TAU = 0.1          # unused by forward, kept for parity with __init__
EPSILON = 1e-8     # unused by forward
LAMBDA_REG = 1.0
WGHT = 10.0

_PER_BLOCK_INPUT_BYTES = 2 * 1024 * 1024   # per-input VMEM block budget


def _round_up(x, m):
    return -(-x // m) * m


def _pick_block_rows(batch, seq, itemsize):
    """Block row count: multiple of 8, fits the VMEM budget, >= ~4 grid steps."""
    rows_budget = _PER_BLOCK_INPUT_BYTES // max(1, seq * itemsize)
    rows_budget = max(8, (rows_budget // 8) * 8)
    b_pad8 = _round_up(batch, 8)
    # Aim for >= 4 grid steps so a parallel grid axis can span both v7x TCs.
    target = max(8, _round_up(-(-batch // 4), 8))
    return max(8, min(rows_budget, b_pad8, target))


def _vmem_limit_bytes(tb, seq, itemsize):
    """Scoped VMEM limit from the actual working set, capped for v7x (64 MiB)."""
    in_buffers = 2 * 2 * tb * seq * itemsize     # 2 inputs x double-buffered blocks
    f32_tmp = 8 * tb * seq * 4                   # upcasts, diffs, squares (generous)
    limit = in_buffers + f32_tmp + (4 << 20)     # headroom for output/compiler scratch
    return int(min(max(limit, 16 << 20), 40 << 20))


def _make_partial_sums_kernel(batch, tb, seq, mask_tail_rows):
    """Per-block partial sums, one lane-dense (8, 128) tile per grid step.

    Row layout of the output tile (value broadcast across all 128 lanes):
      row 0: sum((pred - true)^2)
      row 1: sum over rows of (std(pred) - std(true))^2          (unbiased std)
      row 2: sum((pred_diff - true_diff)^2)
      row 3: sum over rows of (std(pred_diff) - std(true_diff))^2
    """
    t = seq
    inv_t = 1.0 / t
    inv_tm1 = 1.0 / (t - 1)
    inv_tm2 = 1.0 / (t - 2)

    def row_std(x, inv_n, inv_nm1):
        # One-pass variance: single sweep over x (sum and sum-of-squares).
        s = jnp.sum(x, axis=1, keepdims=True)
        ss = jnp.sum(x * x, axis=1, keepdims=True)
        var = (ss - s * s * inv_n) * inv_nm1
        return jnp.sqrt(jnp.maximum(var, 0.0))          # clamp rounding negatives

    def kernel(pred_ref, true_ref, out_ref):
        pred = pred_ref[...].astype(jnp.float32)
        true = true_ref[...].astype(jnp.float32)

        if mask_tail_rows:
            # Ragged last block: zero out rows past the true batch size.
            rows_left = batch - pl.program_id(0) * tb
            row_id = jax.lax.broadcasted_iota(jnp.int32, (tb, 1), 0)
            rv = row_id < rows_left
            pred = jnp.where(rv, pred, 0.0)
            true = jnp.where(rv, true, 0.0)

        # ---- plain squared error ------------------------------------------
        err = pred - true
        sse = jnp.sum(err * err)

        # ---- per-row std of pred / true (one-pass) -------------------------
        std_p = row_std(pred, inv_t, inv_tm1)
        std_t = row_std(true, inv_t, inv_tm1)
        dstd = std_p - std_t
        std_sq_sum = jnp.sum(dstd * dstd)

        # ---- first-order diffs via lane roll + (1, t) mask ------------------
        lane = jax.lax.broadcasted_iota(jnp.int32, (1, t), 1)
        lane_valid = lane < (t - 1)                      # drop wraparound lane
        # roll by t-1: lane i becomes x[:, i+1]
        dp = jnp.where(lane_valid, pltpu.roll(pred, shift=t - 1, axis=1) - pred, 0.0)
        dt = jnp.where(lane_valid, pltpu.roll(true, shift=t - 1, axis=1) - true, 0.0)

        ed = dp - dt
        sde = jnp.sum(ed * ed)

        # diff std: t-1 valid samples (masked lane contributes exactly 0)
        std_dp = row_std(dp, inv_tm1, inv_tm2)
        std_dt = row_std(dt, inv_tm1, inv_tm2)
        ddstd = std_dp - std_dt
        d_std_sq_sum = jnp.sum(ddstd * ddstd)

        # ---- lane-dense (8, 128) partial-sum tile ---------------------------
        rid = jax.lax.broadcasted_iota(jnp.int32, (8, 128), 0)
        tile = jnp.where(rid == 0, sse,
               jnp.where(rid == 1, std_sq_sum,
               jnp.where(rid == 2, sde,
               jnp.where(rid == 3, d_std_sq_sum, 0.0))))
        out_ref[0] = tile

    return kernel


@jax.jit
def differential_divergence_loss(pred, true):
    assert pred.shape == true.shape and pred.ndim == 2
    batch, seq = pred.shape
    if seq < 3:
        raise ValueError("T (dim=1) must be >= 3 for the unbiased diff std.")

    itemsize = pred.dtype.itemsize
    tb = _pick_block_rows(batch, seq, itemsize)
    nb = -(-batch // tb)                      # ceil-div; last block may be ragged
    mask_tail_rows = (batch % tb) != 0        # static: masking code only if needed

    kernel = _make_partial_sums_kernel(batch, tb, seq, mask_tail_rows)

    partials = pl.pallas_call(
        kernel,
        out_shape=jax.ShapeDtypeStruct((nb, 8, 128), jnp.float32),
        grid=(nb,),
        in_specs=[
            pl.BlockSpec((tb, seq), lambda i: (i, 0)),
            pl.BlockSpec((tb, seq), lambda i: (i, 0)),
        ],
        out_specs=pl.BlockSpec((1, 8, 128), lambda i: (i, 0, 0)),
        compiler_params=pltpu.CompilerParams(
            dimension_semantics=("parallel",),
            vmem_limit_bytes=_vmem_limit_bytes(tb, seq, itemsize),
        ),
    )(pred, true)

    # Final tiny reduction in plain JAX (fused by XLA).
    sums = jnp.sum(partials[:, :4, 0], axis=0)   # [sse, std_sq, sde, d_std_sq]
    sse, std_sq, sde, d_std_sq = sums[0], sums[1], sums[2], sums[3]

    mse_loss = sse / (batch * seq)
    std_loss = std_sq / batch
    reg_mse = sde / (batch * (seq - 1))
    reg_std = d_std_sq / batch

    # Matches the PyTorch module: total uses literal 10s, while the returned
    # component is lambda_reg * reg_std.
    total_loss = mse_loss + 10.0 * reg_mse + 10.0 * reg_std + WGHT * std_loss
    return (total_loss, mse_loss, reg_mse, LAMBDA_REG * reg_std, WGHT * std_loss)


def _reference(pred, true):
    """Pure-JAX reference for sanity checking."""
    pred = pred.astype(jnp.float32)
    true = true.astype(jnp.float32)
    mse_loss = jnp.mean((pred - true) ** 2)
    std_loss = jnp.mean(
        (jnp.std(pred, axis=1, ddof=1) - jnp.std(true, axis=1, ddof=1)) ** 2
    )
    pred_diff = pred[:, 1:] - pred[:, :-1]
    true_diff = true[:, 1:] - true[:, :-1]
    reg_mse = jnp.mean((pred_diff - true_diff) ** 2)
    reg_std = jnp.mean(
        (jnp.std(pred_diff, axis=1, ddof=1) - jnp.std(true_diff, axis=1, ddof=1)) ** 2
    )
    total = mse_loss + 10.0 * reg_mse + 10.0 * reg_std + WGHT * std_loss
    return total, mse_loss, reg_mse, LAMBDA_REG * reg_std, WGHT * std_loss


if __name__ == "__main__":
    key = jax.random.PRNGKey(0)
    k1, k2, k3, k4 = jax.random.split(key, 4)

    # Case 1: batch divisible by the block rows (unmasked fast path).
    B, T = 8, 128  # (batch, seq); dim=1 of the PyTorch module is T
    pred = jax.random.normal(k1, (B, T), dtype=jnp.float32)
    true = jax.random.normal(k2, (B, T), dtype=jnp.float32)
    got = jax.block_until_ready(differential_divergence_loss(pred, true))
    want = _reference(pred, true)
    for g, w in zip(got, want):
        assert jnp.allclose(g, w, rtol=1e-3, atol=1e-6), (g, w)

    # Case 2: ragged batch -> exercises in-kernel tail-row masking (no jnp.pad).
    B2, T2 = 20, 128
    pred2 = jax.random.normal(k3, (B2, T2), dtype=jnp.float32)
    true2 = jax.random.normal(k4, (B2, T2), dtype=jnp.float32)
    got2 = jax.block_until_ready(differential_divergence_loss(pred2, true2))
    want2 = _reference(pred2, true2)
    for g, w in zip(got2, want2):
        assert jnp.allclose(g, w, rtol=1e-3, atol=1e-6), (g, w)

    print("KERNEL_OK")
</pallas_src>

<mosaic_0001>
module attributes {stable_mosaic.version = 11 : i64} {
  func.func @kernel(%arg0: i32, %arg1: memref<8x128xf32, #tpu.memory_space<vmem>>, %arg2: memref<8x128xf32, #tpu.memory_space<vmem>>, %arg3: memref<1x8x128xf32, #tpu.memory_space<vmem>>) attributes {dimension_semantics = [#tpu.dimension_semantics<parallel>], iteration_bounds = array<i64: 1>, scalar_prefetch = 0 : i64, scratch_operands = 0 : i64, tpu.core_type = #tpu.core_type<tc>, window_params = [{transform_indices = @transform_0, window_bounds = array<i64: 8, 128>}, {transform_indices = @transform_1, window_bounds = array<i64: 8, 128>}, {transform_indices = @transform_2, window_bounds = array<i64: 1, 8, 128>}]} {
    %c0 = arith.constant 0 : index
    %c0_0 = arith.constant 0 : index
    %0 = vector.load %arg1[%c0, %c0_0] : memref<8x128xf32, #tpu.memory_space<vmem>>, vector<8x128xf32>
    %c0_1 = arith.constant 0 : index
    %c0_2 = arith.constant 0 : index
    %1 = vector.load %arg2[%c0_1, %c0_2] : memref<8x128xf32, #tpu.memory_space<vmem>>, vector<8x128xf32>
    %2 = arith.subf %0, %1 : vector<8x128xf32>
    %3 = arith.mulf %2, %2 : vector<8x128xf32>
    %4 = vector.shape_cast %3 : vector<8x128xf32> to vector<1x8x128xf32>
    %cst = arith.constant dense<0.000000e+00> : vector<1xf32>
    %5 = vector.multi_reduction <add>, %4, %cst [1, 2] : vector<1x8x128xf32> to vector<1xf32>
    %6 = vector.shape_cast %5 : vector<1xf32> to vector<1x1x1xf32>
    %7 = vector.extract %6[0, 0, 0] : f32 from vector<1x1x1xf32>
    %cst_3 = arith.constant dense<0.000000e+00> : vector<8xf32>
    %8 = vector.multi_reduction <add>, %0, %cst_3 [1] : vector<8x128xf32> to vector<8xf32>
    %9 = vector.shape_cast %8 : vector<8xf32> to vector<8x1xf32>
    %10 = arith.mulf %0, %0 : vector<8x128xf32>
    %cst_4 = arith.constant dense<0.000000e+00> : vector<8xf32>
    %11 = vector.multi_reduction <add>, %10, %cst_4 [1] : vector<8x128xf32> to vector<8xf32>
    %12 = vector.shape_cast %11 : vector<8xf32> to vector<8x1xf32>
    %13 = arith.mulf %9, %9 : vector<8x1xf32>
    %cst_5 = arith.constant 7.812500e-03 : f32
    %14 = vector.broadcast %cst_5 : f32 to vector<8x1xf32>
    %15 = arith.mulf %13, %14 : vector<8x1xf32>
    %16 = arith.subf %12, %15 : vector<8x1xf32>
    %cst_6 = arith.constant 0.00787401571 : f32
    %17 = vector.broadcast %cst_6 : f32 to vector<8x1xf32>
    %18 = arith.mulf %16, %17 : vector<8x1xf32>
    %cst_7 = arith.constant 0.000000e+00 : f32
    %19 = vector.broadcast %cst_7 : f32 to vector<8x1xf32>
    %20 = arith.maximumf %18, %19 : vector<8x1xf32>
    %21 = math.sqrt %20 : vector<8x1xf32>
    %cst_8 = arith.constant dense<0.000000e+00> : vector<8xf32>
    %22 = vector.multi_reduction <add>, %1, %cst_8 [1] : vector<8x128xf32> to vector<8xf32>
    %23 = vector.shape_cast %22 : vector<8xf32> to vector<8x1xf32>
    %24 = arith.mulf %1, %1 : vector<8x128xf32>
    %cst_9 = arith.constant dense<0.000000e+00> : vector<8xf32>
    %25 = vector.multi_reduction <add>, %24, %cst_9 [1] : vector<8x128xf32> to vector<8xf32>
    %26 = vector.shape_cast %25 : vector<8xf32> to vector<8x1xf32>
    %27 = arith.mulf %23, %23 : vector<8x1xf32>
    %cst_10 = arith.constant 7.812500e-03 : f32
    %28 = vector.broadcast %cst_10 : f32 to vector<8x1xf32>
    %29 = arith.mulf %27, %28 : vector<8x1xf32>
    %30 = arith.subf %26, %29 : vector<8x1xf32>
    %cst_11 = arith.constant 0.00787401571 : f32
    %31 = vector.broadcast %cst_11 : f32 to vector<8x1xf32>
    %32 = arith.mulf %30, %31 : vector<8x1xf32>
    %cst_12 = arith.constant 0.000000e+00 : f32
    %33 = vector.broadcast %cst_12 : f32 to vector<8x1xf32>
    %34 = arith.maximumf %32, %33 : vector<8x1xf32>
    %35 = math.sqrt %34 : vector<8x1xf32>
    %36 = arith.subf %21, %35 : vector<8x1xf32>
    %37 = arith.mulf %36, %36 : vector<8x1xf32>
    %38 = vector.shape_cast %37 : vector<8x1xf32> to vector<1x8x1xf32>
    %cst_13 = arith.constant dense<0.000000e+00> : vector<1xf32>
    %39 = vector.multi_reduction <add>, %38, %cst_13 [1, 2] : vector<1x8x1xf32> to vector<1xf32>
    %40 = vector.shape_cast %39 : vector<1xf32> to vector<1x1x1xf32>
    %41 = vector.extract %40[0, 0, 0] : f32 from vector<1x1x1xf32>
    %42 = tpu.iota {dimensions = array<i32: 1>} : vector<1x128xi32>
    %c127_i32 = arith.constant 127 : i32
    %43 = vector.broadcast %c127_i32 : i32 to vector<1x128xi32>
    %44 = arith.cmpi slt, %42, %43 : vector<1x128xi32>
    %c127_i32_14 = arith.constant 127 : i32
    %45 = tpu.dynamic_rotate %0 by %c127_i32_14 dim 1 : vector<8x128xf32>, i32 -> vector<8x128xf32>
    %46 = arith.subf %45, %0 : vector<8x128xf32>
    %cst_15 = arith.constant 0.000000e+00 : f32
    %47 = vector.shape_cast %44 : vector<1x128xi1> to vector<1x128xi1>
    %48 = vector.broadcast %47 : vector<1x128xi1> to vector<8x128xi1>
    %49 = vector.broadcast %cst_15 : f32 to vector<8x128xf32>
    %50 = arith.select %48, %46, %49 : vector<8x128xi1>, vector<8x128xf32>
    %c127_i32_16 = arith.constant 127 : i32
    %51 = tpu.dynamic_rotate %1 by %c127_i32_16 dim 1 : vector<8x128xf32>, i32 -> vector<8x128xf32>
    %52 = arith.subf %51, %1 : vector<8x128xf32>
    %cst_17 = arith.constant 0.000000e+00 : f32
    %53 = vector.shape_cast %44 : vector<1x128xi1> to vector<1x128xi1>
    %54 = vector.broadcast %53 : vector<1x128xi1> to vector<8x128xi1>
    %55 = vector.broadcast %cst_17 : f32 to vector<8x128xf32>
    %56 = arith.select %54, %52, %55 : vector<8x128xi1>, vector<8x128xf32>
    %57 = arith.subf %50, %56 : vector<8x128xf32>
    %58 = arith.mulf %57, %57 : vector<8x128xf32>
    %59 = vector.shape_cast %58 : vector<8x128xf32> to vector<1x8x128xf32>
    %cst_18 = arith.constant dense<0.000000e+00> : vector<1xf32>
    %60 = vector.multi_reduction <add>, %59, %cst_18 [1, 2] : vector<1x8x128xf32> to vector<1xf32>
    %61 = vector.shape_cast %60 : vector<1xf32> to vector<1x1x1xf32>
    %62 = vector.extract %61[0, 0, 0] : f32 from vector<1x1x1xf32>
    %cst_19 = arith.constant dense<0.000000e+00> : vector<8xf32>
    %63 = vector.multi_reduction <add>, %50, %cst_19 [1] : vector<8x128xf32> to vector<8xf32>
    %64 = vector.shape_cast %63 : vector<8xf32> to vector<8x1xf32>
    %65 = arith.mulf %50, %50 : vector<8x128xf32>
    %cst_20 = arith.constant dense<0.000000e+00> : vector<8xf32>
    %66 = vector.multi_reduction <add>, %65, %cst_20 [1] : vector<8x128xf32> to vector<8xf32>
    %67 = vector.shape_cast %66 : vector<8xf32> to vector<8x1xf32>
    %68 = arith.mulf %64, %64 : vector<8x1xf32>
    %cst_21 = arith.constant 0.00787401571 : f32
    %69 = vector.broadcast %cst_21 : f32 to vector<8x1xf32>
    %70 = arith.mulf %68, %69 : vector<8x1xf32>
    %71 = arith.subf %67, %70 : vector<8x1xf32>
    %cst_22 = arith.constant 0.00793650839 : f32
    %72 = vector.broadcast %cst_22 : f32 to vector<8x1xf32>
    %73 = arith.mulf %71, %72 : vector<8x1xf32>
    %cst_23 = arith.constant 0.000000e+00 : f32
    %74 = vector.broadcast %cst_23 : f32 to vector<8x1xf32>
    %75 = arith.maximumf %73, %74 : vector<8x1xf32>
    %76 = math.sqrt %75 : vector<8x1xf32>
    %cst_24 = arith.constant dense<0.000000e+00> : vector<8xf32>
    %77 = vector.multi_reduction <add>, %56, %cst_24 [1] : vector<8x128xf32> to vector<8xf32>
    %78 = vector.shape_cast %77 : vector<8xf32> to vector<8x1xf32>
    %79 = arith.mulf %56, %56 : vector<8x128xf32>
    %cst_25 = arith.constant dense<0.000000e+00> : vector<8xf32>
    %80 = vector.multi_reduction <add>, %79, %cst_25 [1] : vector<8x128xf32> to vector<8xf32>
    %81 = vector.shape_cast %80 : vector<8xf32> to vector<8x1xf32>
    %82 = arith.mulf %78, %78 : vector<8x1xf32>
    %cst_26 = arith.constant 0.00787401571 : f32
    %83 = vector.broadcast %cst_26 : f32 to vector<8x1xf32>
    %84 = arith.mulf %82, %83 : vector<8x1xf32>
    %85 = arith.subf %81, %84 : vector<8x1xf32>
    %cst_27 = arith.constant 0.00793650839 : f32
    %86 = vector.broadcast %cst_27 : f32 to vector<8x1xf32>
    %87 = arith.mulf %85, %86 : vector<8x1xf32>
    %cst_28 = arith.constant 0.000000e+00 : f32
    %88 = vector.broadcast %cst_28 : f32 to vector<8x1xf32>
    %89 = arith.maximumf %87, %88 : vector<8x1xf32>
    %90 = math.sqrt %89 : vector<8x1xf32>
    %91 = arith.subf %76, %90 : vector<8x1xf32>
    %92 = arith.mulf %91, %91 : vector<8x1xf32>
    %93 = vector.shape_cast %92 : vector<8x1xf32> to vector<1x8x1xf32>
    %cst_29 = arith.constant dense<0.000000e+00> : vector<1xf32>
    %94 = vector.multi_reduction <add>, %93, %cst_29 [1, 2] : vector<1x8x1xf32> to vector<1xf32>
    %95 = vector.shape_cast %94 : vector<1xf32> to vector<1x1x1xf32>
    %96 = vector.extract %95[0, 0, 0] : f32 from vector<1x1x1xf32>
    %97 = tpu.iota {dimensions = array<i32: 0>} : vector<8x128xi32>
    %c0_i32 = arith.constant 0 : i32
    %98 = vector.broadcast %c0_i32 : i32 to vector<8x128xi32>
    %99 = arith.cmpi eq, %97, %98 : vector<8x128xi32>
    %c1_i32 = arith.constant 1 : i32
    %100 = vector.broadcast %c1_i32 : i32 to vector<8x128xi32>
    %101 = arith.cmpi eq, %97, %100 : vector<8x128xi32>
    %c2_i32 = arith.constant 2 : i32
    %102 = vector.broadcast %c2_i32 : i32 to vector<8x128xi32>
    %103 = arith.cmpi eq, %97, %102 : vector<8x128xi32>
    %c3_i32 = arith.constant 3 : i32
    %104 = vector.broadcast %c3_i32 : i32 to vector<8x128xi32>
    %105 = arith.cmpi eq, %97, %104 : vector<8x128xi32>
    %cst_30 = arith.constant 0.000000e+00 : f32
    %106 = vector.broadcast %96 : f32 to vector<8x128xf32>
    %107 = vector.broadcast %cst_30 : f32 to vector<8x128xf32>
    %108 = arith.select %105, %106, %107 : vector<8x128xi1>, vector<8x128xf32>
    %109 = vector.broadcast %62 : f32 to vector<8x128xf32>
    %110 = arith.select %103, %109, %108 : vector<8x128xi1>, vector<8x128xf32>
    %111 = vector.broadcast %41 : f32 to vector<8x128xf32>
    %112 = arith.select %101, %111, %110 : vector<8x128xi1>, vector<8x128xf32>
    %113 = vector.broadcast %7 : f32 to vector<8x128xf32>
    %114 = arith.select %99, %113, %112 : vector<8x128xi1>, vector<8x128xf32>
    %c0_31 = arith.constant 0 : index
    %c0_32 = arith.constant 0 : index
    %c0_33 = arith.constant 0 : index
    %115 = vector.load %arg3[%c0_31, %c0_32, %c0_33] : memref<1x8x128xf32, #tpu.memory_space<vmem>>, vector<1x8x128xf32>
    %116 = vector.shape_cast %115 : vector<1x8x128xf32> to vector<8x128xf32>
    %117 = vector.shape_cast %114 : vector<8x128xf32> to vector<1x8x128xf32>
    tpu.vector_store %arg3[%c0_31, %c0_32, %c0_33], %117 {strides = array<i32>} : memref<1x8x128xf32, #tpu.memory_space<vmem>>, vector<1x8x128xf32>,
    return
  }
  func.func @transform_0(%arg0: i32) -> (i32, i32) {
    %c0_i32 = arith.constant 0 : i32
    %c0_i32_0 = arith.constant 0 : i32
    return %arg0, %c0_i32 : i32, i32
  }
  func.func @transform_1(%arg0: i32) -> (i32, i32) {
    %c0_i32 = arith.constant 0 : i32
    %c0_i32_0 = arith.constant 0 : i32
    return %arg0, %c0_i32 : i32, i32
  }
  func.func @transform_2(%arg0: i32) -> (i32, i32, i32) {
    %c0_i32 = arith.constant 0 : i32
    %c0_i32_0 = arith.constant 0 : i32
    %c0_i32_1 = arith.constant 0 : i32
    return %arg0, %c0_i32, %c0_i32_0 : i32, i32, i32
  }
}

</mosaic_0001>

<bundles_post_ra>
// kernel: differential_divergence_loss.1
= control target key start
LH: loop header
LB: loop body
LE: loop exit
PB: predicated region body
PF: predicated region fallthrough
CT: control target
= control target key end

     0   :  { %7 = vsyncpa [#allocation3], 0  ;;  %s280_s0 = inlined_call_operand.hbm [shape: f32[8,128], index: 0, kind: input, shape index: {}]   ;;  %s281_s1 = inlined_call_operand.hbm [shape: f32[8,128], index: 1, kind: input, shape index: {}]   ;;  %s282_s2 = inlined_call_operand.vmem [shape: f32[1,8,128], index: 2, kind: output, shape index: {}]  }
   0x1   :  { %8 = vsyncpa [#allocation5], 0  ;;  %s249_s9 = smov [#allocation2]   ;;  %s250_s11 = smov [#allocation4]  }
   0x2   :  { %s15_s10 = sshll.u32 %s249_s9, 4  ;;  %s25_s12 = sshll.u32 %s250_s11, 4  ;;  %s16_s10 = int_to_ptr.vmem [resolvable:$true] %s15_s10  ;;  %s26_s12 = int_to_ptr.vmem [resolvable:$true] %s25_s12 }
   0x3   :  { %s213_s13 = scalar_lea.vmem %s16_s10, 128  ;;  %p218_p1 = scmp.lt.s32.totalorder %s16_s10, %s16_s10 }
   0x4   :  { %p214_p0 = scmp.ne.s32.totalorder %s16_s10, %s213_s13  ;;  %p219_p2 = scmp.lt.s32.totalorder %s213_s13, %s213_s13 }
   0x6   :  { %p220_p3 = por %p219_p2, %p218_p1 }
   0x8   :  { %p221_p4 = pnand %p220_p3, %p214_p0 }
   0xa   :  { %224 = shalt.err (!%p221_p4)
}
   0xb   :  { %18 = dma.hbm_to_vmem [thread:$0]  %s280_s0, 128, %s16_s10, [#allocation3]  }
   0xc   :  { %s233_s16 = scalar_lea.vmem %s26_s12, 128  ;;  %p238_p6 = scmp.lt.s32.totalorder %s26_s12, %s26_s12 }
   0xd   :  { %p234_p5 = scmp.ne.s32.totalorder %s26_s12, %s233_s16  ;;  %p239_p7 = scmp.lt.s32.totalorder %s233_s16, %s233_s16 }
   0xf   :  { %p240_p8 = por %p239_p7, %p238_p6 }
  0x11   :  { %p241_p9 = pnand %p240_p8, %p234_p5 }
  0x13   :  { %244 = shalt.err (!%p241_p9)
}
  0x14   :  { %28 = dma.hbm_to_vmem [thread:$0]  %s281_s1, 128, %s26_s12, [#allocation5]  }
  0x15   :  { %245 = dma.done.wait [#allocation3], 128  }
  0x16   :  { %246 = vsyncadd [#allocation3], 4294967168 }
  0x17   :  { %247 = dma.done.wait [#allocation5], 128  }
  0x18   :  { %248 = vsyncadd [#allocation5], 4294967168  ;;  %v35_v0 = vld [vmem:[#allocation2] sm:$0xff]  ;;  %s251_s19 = smov 127   ;;  %v36_v1 = vld [vmem:[#allocation4] sm:$0xff]  ;;  %v95_v4 = vlaneseq  ;;  %vm84_vm5 = vcmask 7168  }
  0x19   :  { %48 = vadd.xlane.f32.xlu1 %v35_v0  ;;  %98 = vrot.lane.b32.xlu0 %v35_v0, %s251_s19  ;;  %v50_v2 = vmul.f32 %v35_v0, %v35_v0  ;;  %v67_v3 = vmul.f32 %v36_v1, %v36_v1  ;;  %v37_v13 = vsub.f32 %v35_v0, %v36_v1 }
  0x1a   :  { %v96_v5 = vand.u32 127, %v95_v4 }
  0x1b   :  { %v38_v15 = vmul.f32 %v37_v13, %v37_v13 }
  0x1c   :  { %vm97_vm0 = vcmp.lt.s32.totalorder %v96_v5, 127 }
  0x1d   :  { %65 = vadd.xlane.f32.xlu1 %v36_v1  ;;  %104 = vrot.lane.b32.xlu0 %v36_v1, %s251_s19 }
  0x21   :  { %51 = vadd.xlane.f32.xlu1 %v50_v2 }
  0x25   :  { %68 = vadd.xlane.f32.xlu1 %v67_v3 }
  0x8b   :  { %v99_v6 = vpop.permute.xlu0 %98 }
  0x8c   :  { %v100_v7 = vsub.f32 %v99_v6, %v35_v0 }
  0x8e   :  { %v103_v8 = vsel %vm97_vm0, %v100_v7, 0.0 }
  0x8f   :  { %119 = vadd.xlane.f32.xlu0 %v103_v8  ;;  %v105_v9 = vpop.permute.xlu0 %104  ;;  %v121_v12 = vmul.f32 %v103_v8, %v103_v8 }
  0x90   :  { %v106_v10 = vsub.f32 %v105_v9, %v36_v1 }
  0x92   :  { %v107_v11 = vsel %vm97_vm0, %v106_v10, 0.0 }
  0x93   :  { %136 = vadd.xlane.f32.xlu1 %v107_v11  ;;  %v138_v14 = vmul.f32 %v107_v11, %v107_v11  ;;  %v108_v42 = vsub.f32 %v103_v8, %v107_v11 }
  0x95   :  { %v109_v44 = vmul.f32 %v108_v42, %v108_v42 }
  0x97   :  { %122 = vadd.xlane.f32.xlu1 %v121_v12 }
  0x9b   :  { %139 = vadd.xlane.f32.xlu1 %v138_v14 }
  0x9f   :  { %39 = vadd.xlane.f32.xlu1 %v38_v15 }
  0xa2   :  { %v49_v16 = vpop.xlane.xlu1 %48 }
  0xa3   :  { %v53_v17 = vmul.f32 %v49_v16, %v49_v16 }
  0xa5   :  { %v54_v19 = vmul.f32 0.0078125, %v53_v17 }
  0xa6   :  { %v66_v18 = vpop.xlane.xlu1 %65 }
  0xa7   :  { %v70_v20 = vmul.f32 %v66_v18, %v66_v18 }
  0xa9   :  { %v71_v22 = vmul.f32 0.0078125, %v70_v20 }
  0xaa   :  { %v52_v21 = vpop.xlane.xlu1 %51 }
  0xab   :  { %v55_v23 = vsub.f32 %v52_v21, %v54_v19 }
  0xad   :  { %v56_v24 = vmul.f32 0.007874016, %v55_v23 }
  0xae   :  { %v69_v25 = vpop.xlane.xlu1 %68 }
  0xaf   :  { %v57_v26 = vmax.f32 %v56_v24, 0.0  ;;  %v72_v27 = vsub.f32 %v69_v25, %v71_v22 }
  0xb1   :  { %197 = vrsqrt.f32 %v57_v26  ;;  %v73_v28 = vmul.f32 0.007874016, %v72_v27  ;;  %vm60_vm1 = vcmp.eq.f32.partialorder %v57_v26, inf  ;;  %v63_v32 = vand.u32 2147483648, %v57_v26 }
  0xb2   :  { %vm62_vm2 = vcmp.eq.f32.partialorder %v57_v26, 0.0 }
  0xb3   :  { %v74_v29 = vmax.f32 %v73_v28, 0.0 }
  0xb5   :  { %199 = vrsqrt.f32 %v74_v29  ;;  %vm77_vm3 = vcmp.eq.f32.partialorder %v74_v29, inf  ;;  %v80_v35 = vand.u32 2147483648, %v74_v29  ;;  %vm79_vm4 = vcmp.eq.f32.partialorder %v74_v29, 0.0 }
  0xbe   :  { %v198_v30 = vpop.eup %197 }
  0xbf   :  { %v59_v31 = vmul.f32 %v198_v30, %v57_v26 }
  0xc1   :  { %v61_v33 = vsel %vm60_vm1, %v57_v26, %v59_v31 }
  0xc2   :  { %v200_v34 = vpop.eup %199  ;;  %v64_v37 = vsel %vm62_vm2, %v63_v32, %v61_v33 }
  0xc3   :  { %v76_v36 = vmul.f32 %v200_v34, %v74_v29 }
  0xc5   :  { %v78_v38 = vsel %vm77_vm3, %v74_v29, %v76_v36 }
  0xc6   :  { %v81_v39 = vsel %vm79_vm4, %v80_v35, %v78_v38 }
  0xc7   :  { %v82_v40 = vsub.f32 %v64_v37, %v81_v39  ;;  %v166_v37 = vshrl.u32 %v95_v4, 7 }
  0xc9   :  { %v83_v41 = vmul.f32 %v82_v40, %v82_v40  ;;  %vm170_vm10 = vcmp.eq.s32.totalorder %v166_v37, 3  ;;  %vm169_vm11 = vcmp.eq.s32.totalorder %v166_v37, 2  ;;  %vm168_vm12 = vcmp.eq.s32.totalorder %v166_v37, 1 }
  0xca   :  { %vm167_vm13 = vcmp.eq.s32.totalorder %v166_v37, 0 }
  0xcb   :  { %v85_v43 = vsel %vm84_vm5, %v83_v41, 0.0 }
  0xcc   :  { %86 = vadd.xlane.f32.xlu1 %v85_v43 }
  0xd0   :  { %110 = vadd.xlane.f32.xlu1 %v109_v44 }
 0x118   :  { %v120_v45 = vpop.xlane.xlu0 %119 }
 0x119   :  { %v124_v46 = vmul.f32 %v120_v45, %v120_v45 }
 0x11b   :  { %v125_v48 = vmul.f32 0.007874016, %v124_v46 }
 0x11c   :  { %v137_v47 = vpop.xlane.xlu1 %136 }
 0x11d   :  { %v141_v49 = vmul.f32 %v137_v47, %v137_v47 }
 0x11f   :  { %v142_v52 = vmul.f32 0.007874016, %v141_v49 }
 0x120   :  { %v123_v50 = vpop.xlane.xlu1 %122 }
 0x121   :  { %v126_v51 = vsub.f32 %v123_v50, %v125_v48 }
 0x123   :  { %v127_v53 = vmul.f32 0.007936508, %v126_v51 }
 0x124   :  { %v140_v54 = vpop.xlane.xlu1 %139 }
 0x125   :  { %v128_v55 = vmax.f32 %v127_v53, 0.0  ;;  %v143_v56 = vsub.f32 %v140_v54, %v142_v52 }
 0x127   :  { %201 = vrsqrt.f32 %v128_v55  ;;  %v144_v57 = vmul.f32 0.007936508, %v143_v56  ;;  %vm131_vm6 = vcmp.eq.f32.partialorder %v128_v55, inf  ;;  %v134_v8 = vand.u32 2147483648, %v128_v55 }
 0x128   :  { %v40_v58 = vpop.xlane.xlu1 %39  ;;  %vm133_vm8 = vcmp.eq.f32.partialorder %v128_v55, 0.0 }
 0x129   :  { %v145_v59 = vmax.f32 %v144_v57, 0.0  ;;  %v41_v60 = vrot.slane %v40_v58, 4 }
 0x12b   :  { %203 = vrsqrt.f32 %v145_v59  ;;  %v42_v61 = vadd.f32 %v41_v60, %v40_v58  ;;  %vm148_vm7 = vcmp.eq.f32.partialorder %v145_v59, inf  ;;  %v151_v9 = vand.u32 2147483648, %v145_v59 }
 0x12c   :  { %vm150_vm9 = vcmp.eq.f32.partialorder %v145_v59, 0.0 }
 0x12d   :  { %v43_v62 = vrot.slane %v42_v61, 2 }
 0x12f   :  { %v44_v63 = vadd.f32 %v43_v62, %v42_v61 }
 0x131   :  { %v45_v0 = vrot.slane %v44_v63, 1 }
 0x133   :  { %v46_v2 = vadd.f32 %v45_v0, %v44_v63 }
 0x134   :  { %v202_v1 = vpop.eup %201 }
 0x135   :  { %v130_v3 = vmul.f32 %v202_v1, %v128_v55  ;;  %186 = vpush %v46_v2 }
 0x137   :  { %v132_v6 = vsel %vm131_vm6, %v128_v55, %v130_v3 }
 0x138   :  { %v204_v5 = vpop.eup %203  ;;  %v135_v11 = vsel %vm133_vm8, %v134_v8, %v132_v6 }
 0x139   :  { %v147_v7 = vmul.f32 %v204_v5, %v145_v59 }
 0x13b   :  { %v149_v10 = vsel %vm148_vm7, %v145_v59, %v147_v7 }
 0x13c   :  { %v152_v12 = vsel %vm150_vm9, %v151_v9, %v149_v10 }
 0x13d   :  { %v153_v13 = vsub.f32 %v135_v11, %v152_v12 }
 0x13f   :  { %v154_v14 = vmul.f32 %v153_v13, %v153_v13 }
 0x141   :  { %v155_v15 = vsel %vm84_vm5, %v154_v14, 0.0 }
 0x142   :  { %156 = vadd.xlane.f32.xlu0 %v155_v15 }
 0x155   :  { %v87_v16 = vpop.xlane.xlu1 %86 }
 0x156   :  { %v88_v17 = vrot.slane %v87_v16, 4 }
 0x158   :  { %v89_v18 = vadd.f32 %v88_v17, %v87_v16 }
 0x159   :  { %v111_v19 = vpop.xlane.xlu1 %110 }
 0x15a   :  { %v90_v20 = vrot.slane %v89_v18, 2  ;;  %v112_v21 = vrot.slane %v111_v19, 4 }
 0x15c   :  { %v113_v22 = vadd.f32 %v112_v21, %v111_v19  ;;  %v91_v23 = vadd.f32 %v90_v20, %v89_v18 }
 0x15e   :  { %v114_v24 = vrot.slane %v113_v22, 2  ;;  %v92_v25 = vrot.slane %v91_v23, 1 }
 0x160   :  { %v115_v26 = vadd.f32 %v114_v24, %v113_v22  ;;  %v93_v27 = vadd.f32 %v92_v25, %v91_v23 }
 0x162   :  { %188 = vpush %v93_v27  ;;  %v116_v28 = vrot.slane %v115_v26, 1 }
 0x164   :  { %v117_v29 = vadd.f32 %v116_v28, %v115_v26 }
 0x166   :  { %190 = vpush %v117_v29  ;;  %s187_s0 = spop %186 }
 0x167   :  { %v177_v43 = vstv %s187_s0 }
 0x193   :  { %s189_s1 = spop %188 }
 0x194   :  { %v175_v41 = vstv %s189_s1 }
 0x197   :  { %s191_s20 = spop %190 }
 0x198   :  { %v173_v39 = vstv %s191_s20 }
 0x1cb   :  { %v157_v30 = vpop.xlane.xlu0 %156 }
 0x1cc   :  { %v158_v31 = vrot.slane %v157_v30, 4 }
 0x1ce   :  { %v159_v32 = vadd.f32 %v158_v31, %v157_v30 }
 0x1d0   :  { %v160_v33 = vrot.slane %v159_v32, 2 }
 0x1d2   :  { %v161_v34 = vadd.f32 %v160_v33, %v159_v32 }
 0x1d4   :  { %v162_v35 = vrot.slane %v161_v34, 1 }
 0x1d6   :  { %v163_v36 = vadd.f32 %v162_v35, %v161_v34 }
 0x1d8   :  { %192 = vpush %v163_v36 }
 0x209   :  { %s193_s21 = spop %192 }
 0x20a   :  { %v171_v38 = vstv %s193_s21 }
 0x20b   :  { %v172_v40 = vsel %vm170_vm10, %v171_v38, 0.0 }
 0x20c   :  { %v174_v42 = vsel %vm169_vm11, %v173_v39, %v172_v40 }
 0x20d   :  { %v176_v44 = vsel %vm168_vm12, %v175_v41, %v174_v42 }
 0x20e   :  { %v178_v45 = vsel %vm167_vm13, %v177_v43, %v176_v44 }
 0x20f   :  { %179 = vst [vmem:[%s282_s2] sm:$0xff] %v178_v45 }
 0x210   :  { %184 = vsyncpa [#allocation3], 1 }
 0x211   :  { %185 = vsyncpa [#allocation5], 1 }

</bundles_post_ra>
